<compile_context>
chip_gen: v7x
topology: tpu7x:2x2x1
jax: 0.10.0
libtpu: 0.0.40
codegen_flags: <defaults>
</compile_context>

<pallas_src>
import functools

import jax
import jax.numpy as jnp
from jax.experimental import pallas as pl
from jax.experimental.pallas import tpu as pltpu

_MIB = 1024 * 1024


def layernorm_kernel(x_ref, scale_ref, shift_ref, o_ref, *, eps):
    # Single f32 upcast of the block; stats via E[x] / E[x^2] so the data is
    # traversed twice (stats + normalize) instead of three times. f32
    # accumulation keeps the E[x^2] - mean^2 cancellation error negligible for
    # activation-scale data; the max(., 0) clamp guards the pathological case.
    x = x_ref[...].astype(jnp.float32)                               # (tm, D)
    mean = jnp.mean(x, axis=-1, keepdims=True)                       # (tm, 1)
    mean_sq = jnp.mean(x * x, axis=-1, keepdims=True)                # (tm, 1)
    var = jnp.maximum(mean_sq - mean * mean, 0.0)                    # unbiased=False
    inv_std = jax.lax.rsqrt(var + eps)
    y = (x - mean) * inv_std
    y = scale_ref[...].astype(jnp.float32) * y + shift_ref[...].astype(jnp.float32)
    o_ref[...] = y.astype(o_ref.dtype)


def _sublane_pack(dtype) -> int:
    # f32 -> 8, bf16 -> 16, int8/fp8 -> 32 rows per fully-packed vreg.
    return max(8, 32 // jnp.dtype(dtype).itemsize)


def _tpu_info():
    """(vmem_capacity_bytes, tensorcores_per_device) with conservative fallbacks."""
    vmem_cap = 64 * _MIB   # conservative default = smallest (v7x) VMEM
    num_tc = 2             # conservative default: assume grid steps are sharded
    try:
        info = pltpu.get_tpu_info()
        vmem_cap = int(getattr(info, "vmem_capacity_bytes", vmem_cap))
    except Exception:
        pass
    try:
        kind = jax.devices()[0].device_kind.lower()
        # One TensorCore per JAX device on these generations.
        if any(v in kind for v in ("v2", "v3", "v5", "v6")):
            num_tc = 1
    except Exception:
        pass
    return vmem_cap, num_tc


def _pick_row_tile(rows: int, D: int, in_dtype, out_dtype, vmem_cap: int, num_tc: int) -> int:
    pack = _sublane_pack(in_dtype)
    in_b = jnp.dtype(in_dtype).itemsize
    out_b = jnp.dtype(out_dtype).itemsize
    # I/O budget for the double-buffered x/out blocks. 64 MiB parts (v7x) get
    # ~16 MiB so the compiler's f32 intermediates still fit with headroom;
    # 128 MiB parts (v5e/v6e) get 32 MiB. Tiles of >=512 rows already sit at
    # ~85% of the HBM roofline, so the smaller v7x tile costs ~nothing.
    budget = 16 * _MIB if vmem_cap <= 64 * _MIB else 32 * _MIB
    bytes_per_row = 2 * D * (in_b + out_b)
    tm = budget // max(bytes_per_row, 1)
    tm = min(tm, 1024)
    tm = max((tm // pack) * pack, pack)
    tm = min(tm, pl.cdiv(rows, pack) * pack)
    if num_tc > 1 and rows > num_tc * pack:
        # Grid steps are sharded across TensorCores ("parallel" axis): round
        # the step count up to a multiple of num_tc so no core gets ~1.5x the
        # work. Costs at most one extra ~0.35 us grid step. (Sublane alignment
        # may perturb the exact count for extreme D; acceptable.)
        steps = pl.cdiv(pl.cdiv(rows, tm), num_tc) * num_tc
        tm = max(pl.cdiv(pl.cdiv(rows, steps), pack) * pack, pack)
    return tm


def layer_norm(x, scale, shift, *, eps=1e-5):
    orig_shape = x.shape
    D = orig_shape[-1]
    rows = 1
    for s in orig_shape[:-1]:
        rows *= s

    x2 = x.reshape(rows, D)
    scale2 = scale.reshape(1, D)
    shift2 = shift.reshape(1, D)

    out_dtype = x.dtype
    vmem_cap, num_tc = _tpu_info()
    tm = _pick_row_tile(rows, D, x.dtype, out_dtype, vmem_cap, num_tc)

    # No wrapper-side padding: ragged last block is handled by Pallas (OOB
    # reads are per-row garbage that is never written back; OOB writes are
    # dropped), so HBM sees exactly one read + one write of the tensor.
    num_steps = pl.cdiv(rows, tm)

    in_b = jnp.dtype(x.dtype).itemsize
    out_b = jnp.dtype(out_dtype).itemsize
    est_vmem = (
        2 * tm * D * in_b        # double-buffered x block
        + 2 * tm * D * out_b     # double-buffered out block
        + 2 * tm * D * 4         # compiler f32 intermediates (upcast x, y)
        + 4 * D * 4              # double-buffered scale/shift blocks
        + 2 * _MIB               # internal scratch / semaphores
    )
    vmem_limit = int(min(vmem_cap - 10 * _MIB, max(est_vmem, 16 * _MIB)))

    kernel = functools.partial(layernorm_kernel, eps=eps)

    # TODO(synk): for D < 128 (e.g. the demo's D=32) lane utilization is D/128
    # and stores are masked vst.msk; if such shapes matter in production,
    # regroup g=128//D rows per 128-lane slab and reduce over a (tm, g, D)
    # view for a lane-dense layout. For D that is a multiple of 128 the
    # current layout is already optimal.
    # TODO(synk): pipeline_mode=pl.Buffered(3) on the x spec could hide DMA
    # issue latency on v7x if the chosen tile ever drops below ~512 rows; not
    # needed for the budgets used here.
    out = pl.pallas_call(
        kernel,
        out_shape=jax.ShapeDtypeStruct((rows, D), out_dtype),
        grid_spec=pltpu.PrefetchScalarGridSpec(
            num_scalar_prefetch=0,
            grid=(num_steps,),
            in_specs=[
                pl.BlockSpec((tm, D), lambda i: (i, 0)),
                pl.BlockSpec((1, D), lambda i: (0, 0)),
                pl.BlockSpec((1, D), lambda i: (0, 0)),
            ],
            out_specs=pl.BlockSpec((tm, D), lambda i: (i, 0)),
        ),
        compiler_params=pltpu.CompilerParams(
            dimension_semantics=("parallel",),
            vmem_limit_bytes=vmem_limit,
        ),
    )(x2, scale2, shift2)

    return out.reshape(orig_shape)


if __name__ == "__main__":
    key = jax.random.PRNGKey(0)
    batch, seq, hidden = 2, 8, 32

    x = jax.random.normal(key, (batch, seq, hidden), dtype=jnp.float32)
    # Deterministic parameter init matching nn.Parameter(torch.ones/zeros(...)).
    scale = jnp.ones((hidden,), dtype=jnp.float32)
    shift = jnp.zeros((hidden,), dtype=jnp.float32)

    y = layer_norm(x, scale, shift)
    jax.block_until_ready(y)

    # Reference check (pure JAX), matching PyTorch semantics exactly.
    mean = jnp.mean(x, axis=-1, keepdims=True)
    var = jnp.mean((x - mean) ** 2, axis=-1, keepdims=True)
    ref = scale * ((x - mean) / jnp.sqrt(var + 1e-5)) + shift
    assert jnp.allclose(y, ref, atol=1e-5, rtol=1e-5), "mismatch vs reference"

    print("KERNEL_OK")
</pallas_src>

<mosaic_0001>
module attributes {stable_mosaic.version = 11 : i64} {
  func.func @layernorm_kernel(%arg0: i32, %arg1: memref<16x32xf32, #tpu.memory_space<vmem>>, %arg2: memref<1x32xf32, #tpu.memory_space<vmem>>, %arg3: memref<1x32xf32, #tpu.memory_space<vmem>>, %arg4: memref<16x32xf32, #tpu.memory_space<vmem>>) attributes {dimension_semantics = [#tpu.dimension_semantics<parallel>], iteration_bounds = array<i64: 1>, scalar_prefetch = 0 : i64, scratch_operands = 0 : i64, tpu.core_type = #tpu.core_type<tc>, window_params = [{transform_indices = @transform_0, window_bounds = array<i64: 16, 32>}, {pipeline_mode = #tpu.pipeline_mode<synchronous>, transform_indices = @transform_1, window_bounds = array<i64: 1, 32>}, {pipeline_mode = #tpu.pipeline_mode<synchronous>, transform_indices = @transform_2, window_bounds = array<i64: 1, 32>}, {transform_indices = @transform_3, window_bounds = array<i64: 16, 32>}]} {
    %c0 = arith.constant 0 : index
    %c0_0 = arith.constant 0 : index
    %0 = vector.load %arg1[%c0, %c0_0] : memref<16x32xf32, #tpu.memory_space<vmem>>, vector<16x32xf32>
    %cst = arith.constant dense<0.000000e+00> : vector<16xf32>
    %1 = vector.multi_reduction <add>, %0, %cst [1] : vector<16x32xf32> to vector<16xf32>
    %2 = vector.shape_cast %1 : vector<16xf32> to vector<16x1xf32>
    %cst_1 = arith.constant 3.200000e+01 : f32
    %3 = vector.broadcast %cst_1 : f32 to vector<16x1xf32>
    %4 = arith.divf %2, %3 : vector<16x1xf32>
    %5 = arith.mulf %0, %0 : vector<16x32xf32>
    %cst_2 = arith.constant dense<0.000000e+00> : vector<16xf32>
    %6 = vector.multi_reduction <add>, %5, %cst_2 [1] : vector<16x32xf32> to vector<16xf32>
    %7 = vector.shape_cast %6 : vector<16xf32> to vector<16x1xf32>
    %cst_3 = arith.constant 3.200000e+01 : f32
    %8 = vector.broadcast %cst_3 : f32 to vector<16x1xf32>
    %9 = arith.divf %7, %8 : vector<16x1xf32>
    %10 = arith.mulf %4, %4 : vector<16x1xf32>
    %11 = arith.subf %9, %10 : vector<16x1xf32>
    %cst_4 = arith.constant 0.000000e+00 : f32
    %12 = vector.broadcast %cst_4 : f32 to vector<16x1xf32>
    %13 = arith.maximumf %11, %12 : vector<16x1xf32>
    %cst_5 = arith.constant 9.99999974E-6 : f32
    %14 = vector.broadcast %cst_5 : f32 to vector<16x1xf32>
    %15 = arith.addf %13, %14 : vector<16x1xf32>
    %16 = math.rsqrt %15 : vector<16x1xf32>
    %17 = vector.broadcast %4 : vector<16x1xf32> to vector<16x32xf32>
    %18 = arith.subf %0, %17 : vector<16x32xf32>
    %19 = vector.broadcast %16 : vector<16x1xf32> to vector<16x32xf32>
    %20 = arith.mulf %18, %19 : vector<16x32xf32>
    %c0_6 = arith.constant 0 : index
    %c0_7 = arith.constant 0 : index
    %21 = vector.load %arg2[%c0_6, %c0_7] : memref<1x32xf32, #tpu.memory_space<vmem>>, vector<1x32xf32>
    %22 = vector.broadcast %21 : vector<1x32xf32> to vector<16x32xf32>
    %23 = arith.mulf %22, %20 : vector<16x32xf32>
    %c0_8 = arith.constant 0 : index
    %c0_9 = arith.constant 0 : index
    %24 = vector.load %arg3[%c0_8, %c0_9] : memref<1x32xf32, #tpu.memory_space<vmem>>, vector<1x32xf32>
    %25 = vector.broadcast %24 : vector<1x32xf32> to vector<16x32xf32>
    %26 = arith.addf %23, %25 : vector<16x32xf32>
    %c0_10 = arith.constant 0 : index
    %c0_11 = arith.constant 0 : index
    %27 = vector.load %arg4[%c0_10, %c0_11] : memref<16x32xf32, #tpu.memory_space<vmem>>, vector<16x32xf32>
    tpu.vector_store %arg4[%c0_10, %c0_11], %26 {strides = array<i32>} : memref<16x32xf32, #tpu.memory_space<vmem>>, vector<16x32xf32>,
    return
  }
  func.func @transform_0(%arg0: i32) -> (i32, i32) {
    %c0_i32 = arith.constant 0 : i32
    %c0_i32_0 = arith.constant 0 : i32
    return %arg0, %c0_i32 : i32, i32
  }
  func.func @transform_1(%arg0: i32) -> (i32, i32) {
    %c0_i32 = arith.constant 0 : i32
    %c0_i32_0 = arith.constant 0 : i32
    %c0_i32_1 = arith.constant 0 : i32
    return %c0_i32, %c0_i32_0 : i32, i32
  }
  func.func @transform_2(%arg0: i32) -> (i32, i32) {
    %c0_i32 = arith.constant 0 : i32
    %c0_i32_0 = arith.constant 0 : i32
    %c0_i32_1 = arith.constant 0 : i32
    return %c0_i32, %c0_i32_0 : i32, i32
  }
  func.func @transform_3(%arg0: i32) -> (i32, i32) {
    %c0_i32 = arith.constant 0 : i32
    %c0_i32_0 = arith.constant 0 : i32
    return %arg0, %c0_i32 : i32, i32
  }
}

</mosaic_0001>

<bundles_post_ra>
// kernel: tpu_custom_call.1
= control target key start
LH: loop header
LB: loop body
LE: loop exit
PB: predicated region body
PF: predicated region fallthrough
CT: control target
= control target key end

     0   :  { %8 = vsyncpa [#allocation3], 0  ;;  %s226_s0 = inlined_call_operand.hbm [shape: f32[16,32], index: 0, kind: input, shape index: {}]   ;;  %s227_s1 = inlined_call_operand.vmem [shape: f32[1,32], index: 1, kind: input, shape index: {}]   ;;  %s228_s2 = inlined_call_operand.vmem [shape: f32[1,32], index: 2, kind: input, shape index: {}]   ;;  %s229_s3 = inlined_call_operand.hbm [shape: f32[16,32], index: 3, kind: output, shape index: {}]  }
   0x1   :  { %9 = vsyncpa [#allocation4], 0  ;;  %s160_s12 = smov [#allocation2]   ;;  %s112_s16 = scalar_lea.hbm %s226_s0, 256 }
   0x2   :  { %s15_s13 = sshll.u32 %s160_s12, 4  ;;  %p113_p0 = scmp.ne.s32.totalorder %s226_s0, %s112_s16  ;;  %s16_s13 = int_to_ptr.vmem [resolvable:$true] %s15_s13 }
   0x3   :  { %p116_p1 = scmp.lt.u32.totalorder %s112_s16, %s226_s0 }
   0x5   :  { %p118_p2 = pnand %p116_p1, %p113_p0 }
   0x7   :  { %121 = shalt.err (!%p118_p2)
}
   0x8   :  { %s122_s21 = scalar_lea.vmem %s16_s13, 256  ;;  %p127_p4 = scmp.lt.s32.totalorder %s16_s13, %s16_s13 }
   0x9   :  { %p123_p3 = scmp.ne.s32.totalorder %s16_s13, %s122_s21  ;;  %p128_p5 = scmp.lt.s32.totalorder %s122_s21, %s122_s21 }
   0xb   :  { %p129_p6 = por %p128_p5, %p127_p4 }
   0xd   :  { %p130_p7 = pnand %p129_p6, %p123_p3 }
   0xf   :  { %133 = shalt.err (!%p130_p7)
}
  0x10   :  { %s161_s22 = smov 128   ;;  %s162_s23 = smov 8  }
  0x11   :  { %21 = dma.hbm_to_vmem [thread:$0]  %s226_s0, 256, %s16_s13, [#allocation3], %s161_s22, %s161_s22, %s162_s23  }
  0x12   :  { %156 = dma.done.wait [#allocation3], 256  }
  0x13   :  { %157 = vsyncadd [#allocation3], 4294967040  ;;  %vm31_vm0 = vcmask 261120   ;;  %v29_v0 = vld [vmem:[#allocation2] sm:$0xff]  ;;  %v30_v1 = vld [vmem:[#allocation2 + $0x8] sm:$0xff]  ;;  %s163_s29 = smov [#allocation5]  }
  0x14   :  { %v32_v2 = vsel %vm31_vm0, %v29_v0, 0.0  ;;  %v41_v3 = vmul.f32 %v29_v0, %v29_v0  ;;  %v42_v4 = vmul.f32 %v30_v1, %v30_v1  ;;  %v35_v6 = vsel %vm31_vm0, %v30_v1, 0.0  ;;  %v102_v26 = vld [vmem:[%s227_s1] ss:$0 sm:$0xff]  ;;  %s90_s30 = sshll.u32 %s163_s29, 4  ;;  %s91_s30 = int_to_ptr.vmem [resolvable:$true] %s90_s30 }
  0x15   :  { %33 = vadd.xlane.f32.xlu0 %v32_v2  ;;  %v103_v28 = vld [vmem:[%s228_s2] ss:$0 sm:$0xff]  ;;  %s134_s1 = scalar_lea.vmem %s91_s30, 256  ;;  %p139_p9 = scmp.lt.s32.totalorder %s91_s30, %s91_s30 }
  0x16   :  { %v43_v5 = vsel %vm31_vm0, %v41_v3, 0.0  ;;  %v46_v7 = vsel %vm31_vm0, %v42_v4, 0.0  ;;  %p135_p8 = scmp.ne.s32.totalorder %s91_s30, %s134_s1  ;;  %p140_p10 = scmp.lt.s32.totalorder %s134_s1, %s134_s1 }
  0x17   :  { %44 = vadd.xlane.f32.xlu1 %v43_v5 }
  0x18   :  { %p141_p11 = por %p140_p10, %p139_p9 }
  0x19   :  { %36 = vadd.xlane.f32.xlu0 %v35_v6 }
  0x1a   :  { %p142_p12 = pnand %p141_p11, %p135_p8 }
  0x1b   :  { %47 = vadd.xlane.f32.xlu1 %v46_v7 }
  0xa2   :  { %v34_v8 = vpop.xlane.xlu0 %33 }
  0xa3   :  { %v39_v9 = vmul.f32 0.03125, %v34_v8 }
  0xa4   :  { %v45_v10 = vpop.xlane.xlu1 %44 }
  0xa5   :  { %v51_v11 = vmul.f32 %v39_v9, %v39_v9  ;;  %v49_v12 = vmul.f32 0.03125, %v45_v10  ;;  %v61_v24 = vsub.f32 %v29_v0, %v39_v9 }
  0xa6   :  { %v37_v13 = vpop.xlane.xlu0 %36 }
  0xa7   :  { %v53_v14 = vsub.f32 %v49_v12, %v51_v11  ;;  %v40_v15 = vmul.f32 0.03125, %v37_v13 }
  0xa8   :  { %v48_v16 = vpop.xlane.xlu1 %47 }
  0xa9   :  { %v55_v17 = vmax.f32 %v53_v14, 0.0  ;;  %v52_v18 = vmul.f32 %v40_v15, %v40_v15  ;;  %v50_v19 = vmul.f32 0.03125, %v48_v16  ;;  %v62_v29 = vsub.f32 %v30_v1, %v40_v15 }
  0xab   :  { %v57_v20 = vadd.f32 1e-05, %v55_v17  ;;  %v54_v21 = vsub.f32 %v50_v19, %v52_v18 }
  0xad   :  { %108 = vrsqrt.f32 %v57_v20  ;;  %v56_v22 = vmax.f32 %v54_v21, 0.0 }
  0xaf   :  { %v58_v23 = vadd.f32 1e-05, %v56_v22 }
  0xb1   :  { %110 = vrsqrt.f32 %v58_v23 }
  0xb7   :  { %v109_v25 = vpop.eup %108 }
  0xb8   :  { %v63_v27 = vmul.f32 %v109_v25, %v61_v24 }
  0xba   :  { %v72_v30 = vmul.f32 %v102_v26, %v63_v27 }
  0xbb   :  { %v111_v31 = vpop.eup %110 }
  0xbc   :  { %v64_v32 = vmul.f32 %v111_v31, %v62_v29  ;;  %v81_v33 = vadd.f32 %v103_v28, %v72_v30 }
  0xbe   :  { %v73_v34 = vmul.f32 %v102_v26, %v64_v32  ;;  %83 = vst.msk [vmem:[#allocation5] sm:$0xff] %vm31_vm0, %v81_v33 }
  0xc0   :  { %v82_v35 = vadd.f32 %v103_v28, %v73_v34 }
  0xc2   :  { %84 = vst.msk [vmem:[#allocation5 + $0x8] sm:$0xff] %vm31_vm0, %v82_v35 }
  0xc3   :  { %145 = shalt.err (!%p142_p12)
}
  0xc4   :  { %s146_s5 = scalar_lea.hbm %s229_s3, 256 }
  0xc5   :  { %p147_p13 = scmp.ne.s32.totalorder %s229_s3, %s146_s5  ;;  %p150_p0 = scmp.lt.u32.totalorder %s146_s5, %s229_s3 }
  0xc7   :  { %p152_p1 = pnand %p150_p0, %p147_p13 }
  0xc9   :  { %155 = shalt.err (!%p152_p1)
}
  0xca   :  { %96 = dma.vmem_to_hbm [thread:$0]  %s91_s30, 256, %s229_s3, [#allocation4], %s161_s22, %s161_s22, %s162_s23  }
  0xcb   :  { %158 = dma.done.wait [#allocation4], 256  }
  0xcc   :  { %159 = vsyncadd [#allocation4], 4294967040 }
  0xcd   :  { %100 = vsyncpa [#allocation3], 1 }
  0xce   :  { %101 = vsyncpa [#allocation4], 1 }

</bundles_post_ra>
